<compile_context>
chip_gen: v7x
topology: tpu7x:2x2x1
jax: 0.10.0
libtpu: 0.0.40
codegen_flags: <defaults>
</compile_context>

<pallas_src>
import functools

import numpy as np
import jax
import jax.numpy as jnp
from jax import lax
from jax.experimental import pallas as pl
from jax.experimental.pallas import tpu as pltpu


def _round_up(a: int, b: int) -> int:
    return ((a + b - 1) // b) * b


def _gelu(h, approximate: bool):
    if approximate:
        # tanh form -> routes the transcendental through the EUP slot.
        c = 0.7978845608028654  # sqrt(2/pi)
        return 0.5 * h * (1.0 + jnp.tanh(c * (h + 0.044715 * h * h * h)))
    # erf form (matches torch.nn.GELU default).
    return 0.5 * h * (1.0 + lax.erf(h * 0.7071067811865476))


# ---------------------------------------------------------------------------
# Kernels  (grid = (m_tiles, h_tiles); h axis is the reduction / "arbitrary")
# ---------------------------------------------------------------------------
def _mlp_kernel_groupmean(x_ref, w1_ref, b1_ref, o_ref, acc_ref, *,
                          groups_per_chunk, cout_p, inv_ratio, approximate):
    """fc1 + GELU + adaptive-avg-pool when pooling is `ratio` lane-aligned adds.

    The wrapper permutes fc1's output columns so padded-hidden column
    j*cout_p + c holds original hidden unit c*ratio + j; each hidden chunk
    therefore contains whole groups and pooling is pure VPU adds.
    """
    k = pl.program_id(1)

    @pl.when(k == 0)
    def _():
        acc_ref[...] = jnp.zeros_like(acc_ref)

    h = jnp.dot(x_ref[...], w1_ref[...], preferred_element_type=jnp.float32)
    h = _gelu(h + b1_ref[...], approximate)
    part = h[:, 0:cout_p]
    for j in range(1, groups_per_chunk):            # static, small trip count
        part = part + h[:, j * cout_p:(j + 1) * cout_p]
    acc_ref[...] += part

    @pl.when(k == pl.num_programs(1) - 1)
    def _():
        o_ref[...] = (acc_ref[...] * inv_ratio).astype(o_ref.dtype)


def _mlp_kernel_poolmat(x_ref, w1_ref, b1_ref, pool_ref, o_ref, acc_ref, *,
                        approximate):
    """fc1 + GELU + adaptive-avg-pool via a (hidden_chunk, out) averaging matrix.

    Pooling is linear, so per-chunk partial matmuls sum to the exact result.
    """
    # TODO(synk): contiguous pool windows could be done with f32 VPU segment
    # adds over lane slices (avoiding the bf16 cast + narrow second matmul).
    k = pl.program_id(1)

    @pl.when(k == 0)
    def _():
        acc_ref[...] = jnp.zeros_like(acc_ref)

    h = jnp.dot(x_ref[...], w1_ref[...], preferred_element_type=jnp.float32)
    h = _gelu(h + b1_ref[...], approximate)
    acc_ref[...] += jnp.dot(h.astype(pool_ref.dtype), pool_ref[...],
                            preferred_element_type=jnp.float32)

    @pl.when(k == pl.num_programs(1) - 1)
    def _():
        o_ref[...] = acc_ref[...].astype(o_ref.dtype)


# ---------------------------------------------------------------------------
# Wrapper helpers
# ---------------------------------------------------------------------------
def adaptive_avg_pool1d_matrix(L: int, out: int) -> jnp.ndarray:
    """P (L, out) such that y @ P == AdaptiveAvgPool1d(out)(y) along last dim."""
    P = np.zeros((L, out), dtype=np.float32)
    for i in range(out):
        start = (i * L) // out
        end = -((-(i + 1) * L) // out)              # ceil((i+1)*L/out)
        P[start:end, i] = 1.0 / float(end - start)
    return jnp.asarray(P)


def _vmem_limit_bytes() -> int:
    # Half of physical VMEM, clamped to [32 MiB, 96 MiB]:
    #   v5e/v6e (128 MiB) -> 64 MiB, v7x (64 MiB) -> 32 MiB.
    try:
        cap = pltpu.get_tpu_info().vmem_capacity_bytes
    except Exception:
        cap = 128 * 1024 * 1024
    return int(min(96 << 20, max(32 << 20, cap // 2)))


def _choose_tile_m(M, cin_p, tile_h, cout_p, has_pool, budget_bytes):
    """Largest MXU-friendly token tile that fits the VMEM budget."""
    # Per row: double-buffered bf16 x tile, double-buffered f32 out tile,
    # f32 accumulator, f32 (tile_m, tile_h) GELU intermediate.
    per_row = 2 * cin_p * 2 + 2 * cout_p * 4 + cout_p * 4 + tile_h * 4
    # Fixed (independent of tile_m): double-buffered weight/bias chunks and,
    # only on the pool-matrix path, the pool chunk.
    fixed = 2 * (cin_p * tile_h * 2 + tile_h * 4)
    if has_pool:
        fixed += 2 * tile_h * cout_p * 2
    avail = max(budget_bytes - fixed, 16 * per_row)
    tile_m = int(min(1024, avail // per_row))
    tile_m = min(tile_m, _round_up(M, 16))
    # MXU-native row granularity (256 on v6e/v7x, 128 on v5e); never below 16
    # (bf16 sublane packing is 16 rows / vreg).
    for align in (256, 128, 64, 32, 16):
        if tile_m >= align:
            tile_m = (tile_m // align) * align
            break
    else:
        tile_m = 16
    return int(tile_m)


# ---------------------------------------------------------------------------
# Parameter prepacking (hoisted out of the per-forward path)
# ---------------------------------------------------------------------------
def prepack_mlp_params(w1, b1, out_features, *, vmem_budget_bytes=None):
    """Pad / permute / bf16-cast fc1 weights once.

    w1: (in_features, hidden)  float32  (transpose of torch fc1.weight)
    b1: (hidden,)              float32
    """
    Cin, H = int(w1.shape[0]), int(w1.shape[1])
    Cout = int(out_features)

    cin_p = _round_up(Cin, 128)
    cout_p = _round_up(Cout, 128)

    # Grouped (lane-aligned VPU pooling) path only when it does not inflate the
    # hidden/lane dimension -- i.e. Cout % 128 == 0 or ratio == 1.  Otherwise
    # padding every group to 128 lanes costs up to 128/Cout extra MXU FLOPs and
    # weight DMA, so fall back to the pool-matrix path.
    grouped = (H % Cout == 0) and ((H // Cout) * cout_p <= _round_up(H, 128))
    ratio = H // Cout if grouped else 0
    h_p = ratio * cout_p if grouped else _round_up(H, 128)

    if vmem_budget_bytes is None:
        # Full scoped limit minus a few MiB for compiler scratch (no halving).
        vmem_budget_bytes = _vmem_limit_bytes() - (4 << 20)

    # Hidden-chunk size: whole groups per chunk on the grouped path, 128-lane
    # multiples otherwise; target ~512 lanes (MXU friendly on all generations).
    h_align = cout_p if grouped else 128
    tile_h = int(min(h_p, max(h_align, (512 // h_align) * h_align)))
    h_pad = _round_up(h_p, tile_h)      # extra zero columns contribute nothing

    if grouped:
        # hidden unit c*ratio + j  ->  padded column j*cout_p + c
        w1_g = w1.reshape(Cin, Cout, ratio).transpose(0, 2, 1)      # (Cin, r, Cout)
        w1_g = jnp.pad(w1_g, ((0, cin_p - Cin), (0, 0), (0, cout_p - Cout)))
        w1_pad = jnp.pad(w1_g.reshape(cin_p, h_p), ((0, 0), (0, h_pad - h_p)))
        w1_pad = w1_pad.astype(jnp.bfloat16)
        b1_g = jnp.pad(b1.reshape(Cout, ratio).T, ((0, 0), (0, cout_p - Cout)))
        b1_pad = jnp.pad(b1_g.reshape(1, h_p), ((0, 0), (0, h_pad - h_p)))
        b1_pad = b1_pad.astype(jnp.float32)
        pool_pad = None
    else:
        w1_pad = jnp.pad(w1, ((0, cin_p - Cin), (0, h_pad - H))).astype(jnp.bfloat16)
        b1_pad = jnp.pad(b1, (0, h_pad - H)).reshape(1, h_pad).astype(jnp.float32)
        pool = adaptive_avg_pool1d_matrix(H, Cout)
        pool_pad = jnp.pad(pool, ((0, h_pad - H), (0, cout_p - Cout))).astype(jnp.bfloat16)

    return dict(w1=w1_pad, b1=b1_pad, pool=pool_pad,
                grouped=grouped, ratio=ratio,
                in_features=Cin, hidden=H, out_features=Cout,
                cin_p=cin_p, cout_p=cout_p, h_pad=h_pad, tile_h=tile_h,
                vmem_budget=int(vmem_budget_bytes))


# ---------------------------------------------------------------------------
# Forward
# ---------------------------------------------------------------------------
def mlp_forward_prepacked(x, packed, *, approximate_gelu=False, out_dtype=None):
    """x: (B, N, in_features).  Returns (B, N, out_features)."""
    B, N, Cin = x.shape
    assert Cin == packed['in_features'], "input feature mismatch"
    Cout = packed['out_features']
    cin_p, cout_p = packed['cin_p'], packed['cout_p']
    tile_h, h_pad = packed['tile_h'], packed['h_pad']
    grouped = packed['grouped']
    out_dtype = x.dtype if out_dtype is None else out_dtype

    M = B * N
    vmem_limit = packed['vmem_budget'] + (4 << 20)
    tile_m = _choose_tile_m(M, cin_p, tile_h, cout_p,
                            has_pool=not grouped,
                            budget_bytes=packed['vmem_budget'])

    # Keep >=2 token tiles when possible so the parallel axis feeds both
    # TensorCores on v7x (free on single-TC v5e/v6e).
    m_p = _round_up(M, tile_m)
    if m_p // tile_m == 1 and tile_m >= 512:
        tile_m //= 2
        m_p = _round_up(M, tile_m)

    grid = (m_p // tile_m, h_pad // tile_h)

    # Single fused reshape + bf16 cast + pad of the activation slab.
    x_pad = jnp.pad(x.reshape(M, Cin).astype(jnp.bfloat16),
                    ((0, m_p - M), (0, cin_p - Cin)))

    x_spec = pl.BlockSpec((tile_m, cin_p), lambda i, k: (i, 0))
    w1_spec = pl.BlockSpec((cin_p, tile_h), lambda i, k: (0, k))
    b1_spec = pl.BlockSpec((1, tile_h), lambda i, k: (0, k))
    out_spec = pl.BlockSpec((tile_m, cout_p), lambda i, k: (i, 0))
    scratch = [pltpu.VMEM((tile_m, cout_p), jnp.float32)]
    compiler_params = pltpu.CompilerParams(
        dimension_semantics=("parallel", "arbitrary"),
        vmem_limit_bytes=vmem_limit,
    )

    if grouped:
        kernel = functools.partial(
            _mlp_kernel_groupmean,
            groups_per_chunk=tile_h // cout_p,
            cout_p=cout_p,
            inv_ratio=1.0 / float(packed['ratio']),
            approximate=approximate_gelu)
        y = pl.pallas_call(
            kernel,
            out_shape=jax.ShapeDtypeStruct((m_p, cout_p), out_dtype),
            grid_spec=pltpu.PrefetchScalarGridSpec(
                num_scalar_prefetch=0, grid=grid,
                in_specs=[x_spec, w1_spec, b1_spec],
                out_specs=out_spec,
                scratch_shapes=scratch),
            compiler_params=compiler_params,
        )(x_pad, packed['w1'], packed['b1'])
    else:
        pool_spec = pl.BlockSpec((tile_h, cout_p), lambda i, k: (k, 0))
        kernel = functools.partial(_mlp_kernel_poolmat,
                                   approximate=approximate_gelu)
        y = pl.pallas_call(
            kernel,
            out_shape=jax.ShapeDtypeStruct((m_p, cout_p), out_dtype),
            grid_spec=pltpu.PrefetchScalarGridSpec(
                num_scalar_prefetch=0, grid=grid,
                in_specs=[x_spec, w1_spec, b1_spec, pool_spec],
                out_specs=out_spec,
                scratch_shapes=scratch),
            compiler_params=compiler_params,
        )(x_pad, packed['w1'], packed['b1'], packed['pool'])

    return y[:M, :Cout].reshape(B, N, Cout)


def mlp_forward(x, w1, b1, out_features, **kwargs):
    """Convenience wrapper: prepack + forward (prefer prepacking once)."""
    packed = prepack_mlp_params(w1, b1, out_features)
    return mlp_forward_prepacked(x, packed, **kwargs)


# ---------------------------------------------------------------------------
# Pure-JAX reference (f32, no padding) for correctness checking
# ---------------------------------------------------------------------------
def mlp_reference(x, w1, b1, out_features):
    H = w1.shape[1]
    h = jnp.einsum('bnc,ch->bnh', x, w1) + b1
    h = 0.5 * h * (1.0 + lax.erf(h * 0.7071067811865476))
    P = adaptive_avg_pool1d_matrix(H, out_features)
    return jnp.einsum('bnh,ho->bno', h, P)


if __name__ == "__main__":
    key = jax.random.PRNGKey(0)

    def init_params(k, in_features, hidden_features):
        kw, kb = jax.random.split(k)
        bound = 1.0 / np.sqrt(in_features)
        w_t = jax.random.uniform(kw, (hidden_features, in_features),
                                 minval=-bound, maxval=bound, dtype=jnp.float32)
        b = jax.random.uniform(kb, (hidden_features,),
                               minval=-bound, maxval=bound, dtype=jnp.float32)
        return w_t.T, b                      # (Cin, H), (H,)

    kx, kp1, kp2, kp3 = jax.random.split(key, 4)

    B, Ntok, Cin = 2, 8, 32
    x = jax.random.normal(kx, (B, Ntok, Cin), dtype=jnp.float32)

    # Config 1: hidden % out == 0 but Cout < 128 -> guard falls back to the
    # pool-matrix path (the old grouped path would have inflated lanes 4x).
    H1, Cout1 = 64, 32
    w1, b1 = init_params(kp1, Cin, H1)
    out1 = mlp_forward(x, w1, b1, Cout1)
    jax.block_until_ready(out1)
    assert out1.shape == (B, Ntok, Cout1)
    ref1 = mlp_reference(x, w1, b1, Cout1)
    np.testing.assert_allclose(np.asarray(out1), np.asarray(ref1),
                               rtol=5e-2, atol=5e-2)

    # Config 2: ragged hidden/out -> pool-matrix path.
    H2, Cout2 = 48, 20
    w2, b2 = init_params(kp2, Cin, H2)
    out2 = mlp_forward(x, w2, b2, Cout2)
    jax.block_until_ready(out2)
    assert out2.shape == (B, Ntok, Cout2)
    ref2 = mlp_reference(x, w2, b2, Cout2)
    np.testing.assert_allclose(np.asarray(out2), np.asarray(ref2),
                               rtol=5e-2, atol=5e-2)

    # Config 3: Cout multiple of 128 -> fused lane-aligned group-mean pooling
    # path; parameters prepacked once and reused.
    H3, Cout3 = 256, 128
    w3, b3 = init_params(kp3, Cin, H3)
    packed3 = prepack_mlp_params(w3, b3, Cout3)
    out3 = mlp_forward_prepacked(x, packed3)
    jax.block_until_ready(out3)
    assert out3.shape == (B, Ntok, Cout3)
    ref3 = mlp_reference(x, w3, b3, Cout3)
    np.testing.assert_allclose(np.asarray(out3), np.asarray(ref3),
                               rtol=5e-2, atol=5e-2)

    print("KERNEL_OK")
</pallas_src>

<mosaic_0001>
module attributes {stable_mosaic.version = 11 : i64} {
  func.func @_mlp_kernel_poolmat(%arg0: i32, %arg1: i32, %arg2: memref<16x128xbf16, #tpu.memory_space<vmem>>, %arg3: memref<128x128xbf16, #tpu.memory_space<vmem>>, %arg4: memref<1x128xf32, #tpu.memory_space<vmem>>, %arg5: memref<128x128xbf16, #tpu.memory_space<vmem>>, %arg6: memref<16x128xf32, #tpu.memory_space<vmem>>, %arg7: memref<16x128xf32, #tpu.memory_space<vmem>>) attributes {dimension_semantics = [#tpu.dimension_semantics<parallel>, #tpu.dimension_semantics<arbitrary>], iteration_bounds = array<i64: 1, 1>, scalar_prefetch = 0 : i64, scratch_operands = 1 : i64, tpu.core_type = #tpu.core_type<tc>, window_params = [{transform_indices = @transform_0, window_bounds = array<i64: 16, 128>}, {transform_indices = @transform_1, window_bounds = array<i64: 128, 128>}, {transform_indices = @transform_2, window_bounds = array<i64: 1, 128>}, {transform_indices = @transform_3, window_bounds = array<i64: 128, 128>}, {transform_indices = @transform_4, window_bounds = array<i64: 16, 128>}]} {
    %c0_i32 = arith.constant 0 : i32
    %0 = arith.cmpi eq, %arg1, %c0_i32 : i32
    %1 = arith.extui %0 : i1 to i32
    %c0_i32_0 = arith.constant 0 : i32
    %2 = arith.cmpi ne, %1, %c0_i32_0 : i32
    scf.if %2 {
      %cst_18 = arith.constant 0.000000e+00 : f32
      %26 = vector.broadcast %cst_18 : f32 to vector<16x128xf32>
      %c0_19 = arith.constant 0 : index
      %c0_20 = arith.constant 0 : index
      %27 = vector.load %arg7[%c0_19, %c0_20] : memref<16x128xf32, #tpu.memory_space<vmem>>, vector<16x128xf32>
      tpu.vector_store %arg7[%c0_19, %c0_20], %26 {strides = array<i32>} : memref<16x128xf32, #tpu.memory_space<vmem>>, vector<16x128xf32>,
    } else {
    }
    %c0 = arith.constant 0 : index
    %c0_1 = arith.constant 0 : index
    %3 = vector.load %arg2[%c0, %c0_1] : memref<16x128xbf16, #tpu.memory_space<vmem>>, vector<16x128xbf16>
    %c0_2 = arith.constant 0 : index
    %c0_3 = arith.constant 0 : index
    %4 = vector.load %arg3[%c0_2, %c0_3] : memref<128x128xbf16, #tpu.memory_space<vmem>>, vector<128x128xbf16>
    %cst = arith.constant dense<0.000000e+00> : vector<16x128xf32>
    %5 = tpu.matmul %3, %4, %cst {dimension_numbers = #tpu.dot_dimension_numbers<[1], [0], [0], [1], [0, 0, 1, 1], [], []>} : vector<16x128xbf16>, vector<128x128xbf16>, vector<16x128xf32> -> vector<16x128xf32>
    %c0_4 = arith.constant 0 : index
    %c0_5 = arith.constant 0 : index
    %6 = vector.load %arg4[%c0_4, %c0_5] : memref<1x128xf32, #tpu.memory_space<vmem>>, vector<1x128xf32>
    %7 = vector.broadcast %6 : vector<1x128xf32> to vector<16x128xf32>
    %8 = arith.addf %5, %7 : vector<16x128xf32>
    %cst_6 = arith.constant 5.000000e-01 : f32
    %9 = vector.broadcast %cst_6 : f32 to vector<16x128xf32>
    %10 = arith.mulf %9, %8 : vector<16x128xf32>
    %cst_7 = arith.constant 0.707106769 : f32
    %11 = vector.broadcast %cst_7 : f32 to vector<16x128xf32>
    %12 = arith.mulf %8, %11 : vector<16x128xf32>
    %13 = math.erf %12 : vector<16x128xf32>
    %cst_8 = arith.constant 1.000000e+00 : f32
    %14 = vector.broadcast %cst_8 : f32 to vector<16x128xf32>
    %15 = arith.addf %14, %13 : vector<16x128xf32>
    %16 = arith.mulf %10, %15 : vector<16x128xf32>
    %c0_9 = arith.constant 0 : index
    %c0_10 = arith.constant 0 : index
    %17 = vector.load %arg7[%c0_9, %c0_10] : memref<16x128xf32, #tpu.memory_space<vmem>>, vector<16x128xf32>
    %18 = arith.truncf %16 : vector<16x128xf32> to vector<16x128xbf16>
    %c0_11 = arith.constant 0 : index
    %c0_12 = arith.constant 0 : index
    %19 = vector.load %arg5[%c0_11, %c0_12] : memref<128x128xbf16, #tpu.memory_space<vmem>>, vector<128x128xbf16>
    %cst_13 = arith.constant dense<0.000000e+00> : vector<16x128xf32>
    %20 = tpu.matmul %18, %19, %cst_13 {dimension_numbers = #tpu.dot_dimension_numbers<[1], [0], [0], [1], [0, 0, 1, 1], [], []>} : vector<16x128xbf16>, vector<128x128xbf16>, vector<16x128xf32> -> vector<16x128xf32>
    %21 = arith.addf %17, %20 : vector<16x128xf32>
    %c0_14 = arith.constant 0 : index
    %c0_15 = arith.constant 0 : index
    %22 = vector.load %arg7[%c0_14, %c0_15] : memref<16x128xf32, #tpu.memory_space<vmem>>, vector<16x128xf32>
    tpu.vector_store %arg7[%c0_14, %c0_15], %21 {strides = array<i32>} : memref<16x128xf32, #tpu.memory_space<vmem>>, vector<16x128xf32>,
    %c0_i32_16 = arith.constant 0 : i32
    %23 = arith.cmpi eq, %arg1, %c0_i32_16 : i32
    %24 = arith.extui %23 : i1 to i32
    %c0_i32_17 = arith.constant 0 : i32
    %25 = arith.cmpi ne, %24, %c0_i32_17 : i32
    scf.if %25 {
      %c0_18 = arith.constant 0 : index
      %c0_19 = arith.constant 0 : index
      %26 = vector.load %arg7[%c0_18, %c0_19] : memref<16x128xf32, #tpu.memory_space<vmem>>, vector<16x128xf32>
      %c0_20 = arith.constant 0 : index
      %c0_21 = arith.constant 0 : index
      %27 = vector.load %arg6[%c0_20, %c0_21] : memref<16x128xf32, #tpu.memory_space<vmem>>, vector<16x128xf32>
      tpu.vector_store %arg6[%c0_20, %c0_21], %26 {strides = array<i32>} : memref<16x128xf32, #tpu.memory_space<vmem>>, vector<16x128xf32>,
    } else {
    }
    return
  }
  func.func @transform_0(%arg0: i32, %arg1: i32) -> (i32, i32) {
    %c0_i32 = arith.constant 0 : i32
    %c0_i32_0 = arith.constant 0 : i32
    return %arg0, %c0_i32 : i32, i32
  }
  func.func @transform_1(%arg0: i32, %arg1: i32) -> (i32, i32) {
    %c0_i32 = arith.constant 0 : i32
    %c0_i32_0 = arith.constant 0 : i32
    return %c0_i32, %arg1 : i32, i32
  }
  func.func @transform_2(%arg0: i32, %arg1: i32) -> (i32, i32) {
    %c0_i32 = arith.constant 0 : i32
    %c0_i32_0 = arith.constant 0 : i32
    return %c0_i32, %arg1 : i32, i32
  }
  func.func @transform_3(%arg0: i32, %arg1: i32) -> (i32, i32) {
    %c0_i32 = arith.constant 0 : i32
    %c0_i32_0 = arith.constant 0 : i32
    return %arg1, %c0_i32 : i32, i32
  }
  func.func @transform_4(%arg0: i32, %arg1: i32) -> (i32, i32) {
    %c0_i32 = arith.constant 0 : i32
    %c0_i32_0 = arith.constant 0 : i32
    return %arg0, %c0_i32 : i32, i32
  }
}

</mosaic_0001>

<bundles_post_ra>
// kernel: tpu_custom_call.1
= control target key start
LH: loop header
LB: loop body
LE: loop exit
PB: predicated region body
PF: predicated region fallthrough
CT: control target
= control target key end

     0   :  { %9 = vsyncpa [#allocation4], 0  ;;  %s691_s0 = inlined_call_operand.hbm [shape: bf16[16,128], index: 0, kind: input, shape index: {}]   ;;  %s692_s1 = inlined_call_operand.hbm [shape: bf16[128,128], index: 1, kind: input, shape index: {}]   ;;  %s693_s2 = inlined_call_operand.hbm [shape: f32[1,128], index: 2, kind: input, shape index: {}]   ;;  %s694_s3 = inlined_call_operand.hbm [shape: bf16[128,128], index: 3, kind: input, shape index: {}]   ;;  %s695_s4 = inlined_call_operand.hbm [shape: f32[16,128], index: 4, kind: output, shape index: {}]  }
   0x1   :  { %10 = vsyncpa [#allocation7], 0 }
   0x2   :  { %11 = vsyncpa [#allocation10], 0 }
   0x3   :  { %12 = vsyncpa [#allocation5], 0  ;;  %s572_s15 = smov [#allocation6]   ;;  %s573_s17 = smov [#allocation3]  }
   0x4   :  { %s30_s16 = sshll.u32 %s572_s15, 4  ;;  %s18_s18 = sshll.u32 %s573_s17, 4  ;;  %s31_s16 = int_to_ptr.vmem [resolvable:$true] %s30_s16  ;;  %s608_s18 = int_to_ptr.vmem [resolvable:$true] %s18_s18 }
   0x5   :  { %s454_s21 = scalar_lea.hbm %s692_s1, 1024 }
   0x6   :  { %p455_p0 = scmp.ne.s32.totalorder %s692_s1, %s454_s21  ;;  %p458_p1 = scmp.lt.u32.totalorder %s454_s21, %s692_s1 }
   0x8   :  { %p460_p2 = pnand %p458_p1, %p455_p0 }
   0xa   :  { %463 = shalt.err (!%p460_p2)
}
   0xb   :  { %s464_s26 = scalar_lea.vmem %s31_s16, 1024  ;;  %p469_p4 = scmp.lt.s32.totalorder %s31_s16, %s31_s16 }
   0xc   :  { %p465_p3 = scmp.ne.s32.totalorder %s31_s16, %s464_s26  ;;  %p470_p5 = scmp.lt.s32.totalorder %s464_s26, %s464_s26 }
   0xe   :  { %p471_p6 = por %p470_p5, %p469_p4 }
  0x10   :  { %p472_p7 = pnand %p471_p6, %p465_p3 }
  0x12   :  { %475 = shalt.err (!%p472_p7)
}
  0x13   :  { %s574_s27 = smov 64   ;;  %s575_s28 = smov 4  }
  0x14   :  { %36 = dma.hbm_to_vmem [thread:$0]  %s692_s1, 1024, %s31_s16, [#allocation7], %s574_s27, %s574_s27, %s575_s28  }
  0x15   :  { %s476_s7 = scalar_lea.hbm %s691_s0, 128 }
  0x16   :  { %p477_p8 = scmp.ne.s32.totalorder %s691_s0, %s476_s7  ;;  %p480_p9 = scmp.lt.u32.totalorder %s476_s7, %s691_s0 }
  0x18   :  { %p482_p10 = pnand %p480_p9, %p477_p8 }
  0x1a   :  { %485 = shalt.err (!%p482_p10)
}
  0x1b   :  { %s486_s12 = scalar_lea.vmem %s608_s18, 128  ;;  %p491_p12 = scmp.lt.s32.totalorder %s608_s18, %s608_s18 }
  0x1c   :  { %p487_p11 = scmp.ne.s32.totalorder %s608_s18, %s486_s12  ;;  %p492_p13 = scmp.lt.s32.totalorder %s486_s12, %s486_s12 }
  0x1e   :  { %p493_p0 = por %p492_p13, %p491_p12 }
  0x20   :  { %p494_p1 = pnand %p493_p0, %p487_p11 }
  0x22   :  { %497 = shalt.err (!%p494_p1)
}
  0x23   :  { %24 = dma.hbm_to_vmem [thread:$0]  %s691_s0, 128, %s608_s18, [#allocation4], %s574_s27, %s574_s27, %s575_s28  }
  0x24   :  { %s576_s14 = smov [#allocation8]   ;;  %s577_s16 = smov [#allocation9]  }
  0x25   :  { %s43_s15 = sshll.u32 %s576_s14, 4  ;;  %s52_s17 = sshll.u32 %s577_s16, 4  ;;  %s44_s15 = int_to_ptr.vmem [resolvable:$true] %s43_s15  ;;  %s645_s17 = int_to_ptr.vmem [resolvable:$true] %s52_s17 }
  0x26   :  { %s498_s21 = scalar_lea.hbm %s693_s2, 16 }
  0x27   :  { %p499_p2 = scmp.ne.s32.totalorder %s693_s2, %s498_s21  ;;  %p502_p3 = scmp.lt.u32.totalorder %s498_s21, %s693_s2 }
  0x29   :  { %p504_p4 = pnand %p502_p3, %p499_p2 }
  0x2b   :  { %507 = shalt.err (!%p504_p4)
}
  0x2c   :  { %s508_s0 = scalar_lea.vmem %s44_s15, 16  ;;  %s512_s18 = scalar_lea.vmem %s44_s15, 32 }
  0x2d   :  { %p509_p5 = scmp.ne.s32.totalorder %s44_s15, %s508_s0  ;;  %p513_p6 = scmp.lt.s32.totalorder %s44_s15, %s44_s15 }
  0x2e   :  { %p514_p7 = scmp.lt.s32.totalorder %s512_s18, %s508_s0 }
  0x30   :  { %p515_p8 = por %p514_p7, %p513_p6 }
  0x32   :  { %p516_p9 = pnand %p515_p8, %p509_p5 }
  0x34   :  { %519 = shalt.err (!%p516_p9)
}
  0x35   :  { %46 = dma.hbm_to_vmem [thread:$0]  %s693_s2, 16, %s44_s15, [#allocation7]  }
  0x36   :  { %s520_s6 = scalar_lea.hbm %s694_s3, 1024 }
  0x37   :  { %p521_p10 = scmp.ne.s32.totalorder %s694_s3, %s520_s6  ;;  %p524_p11 = scmp.lt.u32.totalorder %s520_s6, %s694_s3 }
  0x39   :  { %p526_p12 = pnand %p524_p11, %p521_p10 }
  0x3b   :  { %529 = shalt.err (!%p526_p12)
}
  0x3c   :  { %s530_s11 = scalar_lea.vmem %s645_s17, 1024  ;;  %p535_p0 = scmp.lt.s32.totalorder %s645_s17, %s645_s17 }
  0x3d   :  { %p531_p13 = scmp.ne.s32.totalorder %s645_s17, %s530_s11  ;;  %p536_p1 = scmp.lt.s32.totalorder %s530_s11, %s530_s11 }
  0x3f   :  { %p537_p2 = por %p536_p1, %p535_p0 }
  0x41   :  { %p538_p3 = pnand %p537_p2, %p531_p13 }
  0x43   :  { %541 = shalt.err (!%p538_p3)
}
  0x44   :  { %58 = dma.hbm_to_vmem [thread:$0]  %s694_s3, 1024, %s645_s17, [#allocation10], %s574_s27, %s574_s27, %s575_s28  }
  0x45   :  { %564 = dma.done.wait [#allocation4], 128  }
  0x46   :  { %565 = vsyncadd [#allocation4], 4294967168 }
  0x47   :  { %566 = dma.done.wait [#allocation7], 1040  }
  0x48   :  { %567 = vsyncadd [#allocation7], 4294966256 }
  0x49   :  { %568 = dma.done.wait [#allocation10], 1024  }
  0x4a   :  { %569 = vsyncadd [#allocation10], 4294966272  ;;  %v578_v0 = vmov 0.0   ;;  %vm579_vm0 = vmmov 0   ;;  %v433_v1 = vld [vmem:[#allocation6] sm:$0xff]   ;;  %v434_v2 = vld [vmem:[#allocation6 + $0x8] sm:$0xff]  }
  0x4b   :  { %382 = vmatprep.subr.bf16.mxu0 %v578_v0  ;;  %398 = vmatprep.mubr.msk.bf16.mxu0 %vm579_vm0, %v578_v0  ;;  %v435_v3 = vld [vmem:[#allocation6 + $0x10] sm:$0xff]   ;;  %v442_v4 = vld [vmem:[#allocation9] sm:$0xff]   ;;  %v436_v5 = vld [vmem:[#allocation6 + $0x18] sm:$0xff]   ;;  %s580_s3 = smov [#allocation11]  }
  0x4c   :  { %402 = vmatprep.subr.bf16.mxu1 %v578_v0  ;;  %418 = vmatprep.mubr.msk.bf16.mxu1 %vm579_vm0, %v578_v0  ;;  %v443_v6 = vld [vmem:[#allocation9 + $0x8] sm:$0xff]   ;;  %v437_v7 = vld [vmem:[#allocation6 + $0x20] sm:$0xff]   ;;  %v440_v10 = vld [vmem:[#allocation6 + $0x38] sm:$0xff]   ;;  %s332_s27 = sshll.u32 %s580_s3, 4  ;;  %s333_s27 = int_to_ptr.vmem [resolvable:$true] %s332_s27 }
  0x4d   :  { %383 = vmatpush3.bf16.msra.mxu0 %v433_v1  ;;  %403 = vmatpush3.bf16.msra.mxu1 %v442_v4  ;;  %v438_v8 = vld [vmem:[#allocation6 + $0x28] sm:$0xff]   ;;  %v439_v9 = vld [vmem:[#allocation6 + $0x30] sm:$0xff]   ;;  %v441_v11 = vld [vmem:[#allocation3] sm:$0xff]   ;;  %s542_s28 = scalar_lea.vmem %s333_s27, 256  ;;  %p547_p5 = scmp.lt.s32.totalorder %s333_s27, %s333_s27 }
  0x4e   :  { %384 = vmatprep.subr.bf16.mxu0 %v578_v0  ;;  %404 = vmatprep.subr.bf16.mxu1 %v578_v0  ;;  %v444_v12 = vld [vmem:[#allocation9 + $0x10] sm:$0xff]   ;;  %v445_v13 = vld [vmem:[#allocation9 + $0x18] sm:$0xff]   ;;  %v446_v14 = vld [vmem:[#allocation9 + $0x20] sm:$0xff]   ;;  %p543_p4 = scmp.ne.s32.totalorder %s333_s27, %s542_s28  ;;  %p548_p6 = scmp.lt.s32.totalorder %s542_s28, %s542_s28 }
  0x4f   :  { %v447_v15 = vld [vmem:[#allocation9 + $0x28] sm:$0xff]   ;;  %v448_v16 = vld [vmem:[#allocation9 + $0x30] sm:$0xff]   ;;  %v449_v17 = vld [vmem:[#allocation9 + $0x38] sm:$0xff]  }
  0x50   :  { %v346_v18 = vld [vmem:[#allocation8] ss:$0 sm:$0xff]  ;;  %p549_p7 = por %p548_p6, %p547_p5 }
  0x51   :  { %385 = vmatpush3.bf16.msra.mxu0 %v434_v2  ;;  %405 = vmatpush3.bf16.msra.mxu1 %v443_v6 }
  0x52   :  { %386 = vmatprep.subr.bf16.mxu0 %v578_v0  ;;  %406 = vmatprep.subr.bf16.mxu1 %v578_v0  ;;  %p550_p8 = pnand %p549_p7, %p543_p4 }
  0x55   :  { %387 = vmatpush3.bf16.msra.mxu0 %v435_v3  ;;  %407 = vmatpush3.bf16.msra.mxu1 %v444_v12 }
  0x56   :  { %388 = vmatprep.subr.bf16.mxu0 %v578_v0  ;;  %408 = vmatprep.subr.bf16.mxu1 %v578_v0 }
  0x59   :  { %389 = vmatpush3.bf16.msra.mxu0 %v436_v5  ;;  %409 = vmatpush3.bf16.msra.mxu1 %v445_v13 }
  0x5a   :  { %390 = vmatprep.subr.bf16.mxu0 %v578_v0  ;;  %410 = vmatprep.subr.bf16.mxu1 %v578_v0 }
  0x5d   :  { %391 = vmatpush3.bf16.msra.mxu0 %v437_v7  ;;  %411 = vmatpush3.bf16.msra.mxu1 %v446_v14 }
  0x5e   :  { %392 = vmatprep.subr.bf16.mxu0 %v578_v0  ;;  %412 = vmatprep.subr.bf16.mxu1 %v578_v0 }
  0x61   :  { %393 = vmatpush3.bf16.msra.mxu0 %v438_v8  ;;  %413 = vmatpush3.bf16.msra.mxu1 %v447_v15 }
  0x62   :  { %394 = vmatprep.subr.bf16.mxu0 %v578_v0  ;;  %414 = vmatprep.subr.bf16.mxu1 %v578_v0 }
  0x65   :  { %395 = vmatpush3.bf16.msra.mxu0 %v439_v9  ;;  %415 = vmatpush3.bf16.msra.mxu1 %v448_v16 }
  0x66   :  { %396 = vmatprep.subr.bf16.mxu0 %v578_v0  ;;  %416 = vmatprep.subr.bf16.mxu1 %v578_v0 }
  0x69   :  { %397 = vmatpush3.bf16.msra.mxu0 %v440_v10  ;;  %417 = vmatpush3.bf16.msra.mxu1 %v449_v17 }
  0x6c   :  { %399 = vmatmul.mubr.bf16.vlgmr.msra.gmra.mrb[0].mxu0 %v441_v11 }
 0x13f   :  { %v191_v19 = vpop.f32.mrb[0].mxu0 }
 0x140   :  { %v192_v20 = vadd.f32 %v346_v18, %v191_v19  ;;  %v400_v21 = vpop.f32.mrb[1].mxu0 }
 0x141   :  { %v194_v22 = vpop.f32.mrb[2].mxu0 }
 0x142   :  { %v200_v23 = vmul.f32 0.70710677, %v192_v20  ;;  %v195_v24 = vadd.f32 %v346_v18, %v194_v22  ;;  %v401_v25 = vpop.f32.mrb[3].mxu0  ;;  %v198_v30 = vmul.f32 0.5, %v192_v20 }
 0x144   :  { %450 = verf.f32 %v200_v23  ;;  %v201_v26 = vmul.f32 0.70710677, %v195_v24  ;;  %v199_v31 = vmul.f32 0.5, %v195_v24 }
 0x146   :  { %452 = verf.f32 %v201_v26 }
 0x14e   :  { %v451_v27 = vpop.eup %450 }
 0x14f   :  { %v204_v28 = vadd.f32 1.0, %v451_v27 }
 0x150   :  { %v453_v29 = vpop.eup %452 }
 0x151   :  { %v205_v32 = vadd.f32 1.0, %v453_v29  ;;  %v206_v33 = vmul.f32 %v204_v28, %v198_v30 }
 0x153   :  { %v207_v34 = vmul.f32 %v205_v32, %v199_v31 }
 0x155   :  { %v210_v35 = vpack.c.bf16 %v207_v34, %v206_v33 }
 0x157   :  { %419 = vmatmul.mubr.bf16.vlgmr.msra.gmra.mrb[0].mxu1 %v210_v35 }
 0x22a   :  { %v309_v36 = vpop.f32.mrb[0].mxu1 }
 0x22b   :  { %325 = vst [vmem:[#allocation11] sm:$0xff] %v309_v36  ;;  %v420_v37 = vpop.f32.mrb[1].mxu1 }
 0x22c   :  { %v312_v38 = vpop.f32.mrb[2].mxu1 }
 0x22d   :  { %326 = vst [vmem:[#allocation11 + $0x8] sm:$0xff] %v312_v38  ;;  %v421_v39 = vpop.f32.mrb[3].mxu1 }
 0x22e   :  { %553 = shalt.err (!%p550_p8)
}
 0x22f   :  { %s554_s14 = scalar_lea.hbm %s695_s4, 256 }
 0x230   :  { %p555_p9 = scmp.ne.s32.totalorder %s695_s4, %s554_s14  ;;  %p558_p10 = scmp.lt.u32.totalorder %s554_s14, %s695_s4 }
 0x232   :  { %p560_p11 = pnand %p558_p10, %p555_p9 }
 0x234   :  { %563 = shalt.err (!%p560_p11)
}
 0x235   :  { %s581_s20 = smov 128   ;;  %s582_s21 = smov 8  }
 0x236   :  { %338 = dma.vmem_to_hbm [thread:$0]  %s333_s27, 256, %s695_s4, [#allocation5], %s581_s20, %s581_s20, %s582_s21  }
 0x237   :  { %570 = dma.done.wait [#allocation5], 256  }
 0x238   :  { %571 = vsyncadd [#allocation5], 4294967040 }
 0x239   :  { %342 = vsyncpa [#allocation4], 1 }
 0x23a   :  { %343 = vsyncpa [#allocation7], 1 }
 0x23b   :  { %344 = vsyncpa [#allocation10], 1 }
 0x23c   :  { %345 = vsyncpa [#allocation5], 1 }

</bundles_post_ra>
